<compile_context>
chip_gen: v7x
topology: tpu7x:2x2x1
jax: 0.10.0
libtpu: 0.0.40
codegen_flags: <defaults>
</compile_context>

<pallas_src>
import jax
import jax.numpy as jnp
from jax.experimental import pallas as pl
from jax.experimental.pallas import tpu as pltpu


def _sepconv_kernel(taps_ref, wdw_ref, wpw_ref, o_ref):
    # taps_ref: (KK, tm, Cp)   strided input taps for this tile of output pixels
    # wdw_ref : (KK, Cp)       depthwise weights, tap-major
    # wpw_ref : (Cp, Op)       pointwise weights, transposed to [C, O]
    # o_ref   : (tm, Op)
    kk = taps_ref.shape[0]
    wdw = wdw_ref[...].astype(jnp.float32)

    # Depthwise conv: per-channel multiply-accumulate across the K*K taps.
    # Elementwise epilogue kept in f32 (v5e VPU has no bf16).
    acc = taps_ref[0].astype(jnp.float32) * wdw[0][None, :]
    for t in range(1, kk):
        acc = acc + taps_ref[t].astype(jnp.float32) * wdw[t][None, :]

    # Pointwise 1x1 conv: MXU matmul. Operands stay in the weight dtype
    # (bf16 weights -> bf16 MXU inputs), accumulate in f32.
    dw = acc.astype(wpw_ref.dtype)
    y = jnp.dot(dw, wpw_ref[...], preferred_element_type=jnp.float32)
    o_ref[...] = y.astype(o_ref.dtype)


def _round_up(v, m):
    return (v + m - 1) // m * m


def separable_conv2d_pallas(x, w_dw, w_pw, *, stride=4, padding=0, dilation=1,
                            tile_m=None):
    """x: [B, C, H, W]; w_dw: [C, 1, K, K]; w_pw: [O, C, 1, 1] -> [B, O, OH, OW]."""
    B, C, H, W = x.shape
    K = w_dw.shape[-1]
    O = w_pw.shape[0]
    KK = K * K

    OH = (H + 2 * padding - dilation * (K - 1) - 1) // stride + 1
    OW = (W + 2 * padding - dilation * (K - 1) - 1) // stride + 1
    M = B * OH * OW

    # NCHW -> NHWC (channels last -> lane axis); pad spatially if needed.
    xh = jnp.transpose(x, (0, 2, 3, 1))
    if padding:
        xh = jnp.pad(xh, ((0, 0), (padding, padding), (padding, padding), (0, 0)))

    # Extract the K*K strided/dilated taps: each has shape [B, OH, OW, C].
    taps = []
    for kh in range(K):
        for kw in range(K):
            h0 = kh * dilation
            w0 = kw * dilation
            taps.append(
                xh[:, h0:h0 + (OH - 1) * stride + 1:stride,
                      w0:w0 + (OW - 1) * stride + 1:stride, :])
    taps = jnp.stack(taps, axis=0).reshape(KK, M, C)

    # Lane-dense channel padding + pixel-tile padding.
    Cp = _round_up(C, 128)
    Op = _round_up(O, 128)
    if tile_m is None:
        tile_m = max(8, min(256, _round_up(M, 8)))
    tile_m = _round_up(tile_m, 8)
    Mp = _round_up(M, tile_m)

    taps = jnp.pad(taps, ((0, 0), (0, Mp - M), (0, Cp - C)))
    wdw2 = jnp.pad(w_dw.reshape(C, KK).T, ((0, 0), (0, Cp - C)))        # (KK, Cp)
    wpw2 = jnp.pad(w_pw.reshape(O, C).T, ((0, Cp - C), (0, Op - O)))    # (Cp, Op)

    # VMEM budget: double-buffered taps/out tiles + resident weights + f32 temps.
    bx = jnp.dtype(x.dtype).itemsize
    bw = jnp.dtype(wpw2.dtype).itemsize
    est = (2 * KK * tile_m * Cp * bx         # streamed tap tiles (double-buffered)
           + 2 * tile_m * Op * bx            # streamed output tiles
           + 2 * (KK * Cp + Cp * Op) * bw    # constant-index resident weights
           + tile_m * (Cp + Op) * 4)         # in-kernel f32 intermediates
    vmem_limit = int(min(max(2 * est, 16 << 20), 48 << 20))

    out = pl.pallas_call(
        _sepconv_kernel,
        out_shape=jax.ShapeDtypeStruct((Mp, Op), x.dtype),
        grid_spec=pltpu.PrefetchScalarGridSpec(
            num_scalar_prefetch=0,
            grid=(Mp // tile_m,),
            in_specs=[
                pl.BlockSpec((KK, tile_m, Cp), lambda i: (0, i, 0)),  # taps tile
                pl.BlockSpec((KK, Cp), lambda i: (0, 0)),             # depthwise w
                pl.BlockSpec((Cp, Op), lambda i: (0, 0)),             # pointwise w
            ],
            out_specs=pl.BlockSpec((tile_m, Op), lambda i: (i, 0)),
        ),
        compiler_params=pltpu.CompilerParams(
            dimension_semantics=("parallel",),
            vmem_limit_bytes=vmem_limit,
        ),
    )(taps, wdw2, wpw2)

    y = out[:M, :O].reshape(B, OH, OW, O)
    return jnp.transpose(y, (0, 3, 1, 2))


def separable_conv2d_reference(x, w_dw, w_pw, *, stride=4, padding=0, dilation=1):
    C = x.shape[1]
    dw = jax.lax.conv_general_dilated(
        x, w_dw,
        window_strides=(stride, stride),
        padding=[(padding, padding), (padding, padding)],
        rhs_dilation=(dilation, dilation),
        dimension_numbers=("NCHW", "OIHW", "NCHW"),
        feature_group_count=C)
    return jax.lax.conv_general_dilated(
        dw, w_pw,
        window_strides=(1, 1),
        padding=[(0, 0), (0, 0)],
        dimension_numbers=("NCHW", "OIHW", "NCHW"))


if __name__ == "__main__":
    # Small shapes consistent with the module defaults:
    # kernel_size=1, stride=4, padding=0, dilation=1, bias=False.
    B, C_IN, C_OUT = 2, 4, 8
    H = W = 16
    K, STRIDE, PAD, DIL = 1, 4, 0, 1

    key = jax.random.PRNGKey(0)
    kx, k1, k2 = jax.random.split(key, 3)

    x = jax.random.normal(kx, (B, C_IN, H, W), dtype=jnp.float32)
    w_dw = jax.random.normal(k1, (C_IN, 1, K, K), dtype=jnp.float32) * 0.2
    w_pw = jax.random.normal(k2, (C_OUT, C_IN, 1, 1), dtype=jnp.float32) * 0.2

    y = separable_conv2d_pallas(x, w_dw, w_pw, stride=STRIDE, padding=PAD,
                                dilation=DIL)
    y = jax.block_until_ready(y)

    y_ref = separable_conv2d_reference(x, w_dw, w_pw, stride=STRIDE, padding=PAD,
                                       dilation=DIL)
    assert y.shape == (B, C_OUT, H // STRIDE, W // STRIDE)
    assert jnp.allclose(y, y_ref, atol=1e-4, rtol=1e-4), "mismatch vs reference"

    print("KERNEL_OK")
</pallas_src>

<mosaic_0001>
module attributes {stable_mosaic.version = 11 : i64} {
  func.func @_sepconv_kernel(%arg0: i32, %arg1: memref<1x32x128xf32, #tpu.memory_space<vmem>>, %arg2: memref<1x128xf32, #tpu.memory_space<vmem>>, %arg3: memref<128x128xf32, #tpu.memory_space<vmem>>, %arg4: memref<32x128xf32, #tpu.memory_space<vmem>>) attributes {dimension_semantics = [#tpu.dimension_semantics<parallel>], iteration_bounds = array<i64: 1>, scalar_prefetch = 0 : i64, scratch_operands = 0 : i64, tpu.core_type = #tpu.core_type<tc>, window_params = [{transform_indices = @transform_0, window_bounds = array<i64: 1, 32, 128>}, {pipeline_mode = #tpu.pipeline_mode<synchronous>, transform_indices = @transform_1, window_bounds = array<i64: 1, 128>}, {pipeline_mode = #tpu.pipeline_mode<synchronous>, transform_indices = @transform_2, window_bounds = array<i64: 128, 128>}, {transform_indices = @transform_3, window_bounds = array<i64: 32, 128>}]} {
    %c0 = arith.constant 0 : index
    %c0_0 = arith.constant 0 : index
    %0 = vector.load %arg2[%c0, %c0_0] : memref<1x128xf32, #tpu.memory_space<vmem>>, vector<1x128xf32>
    %c0_1 = arith.constant 0 : index
    %c0_2 = arith.constant 0 : index
    %c0_3 = arith.constant 0 : index
    %1 = vector.load %arg1[%c0_1, %c0_2, %c0_3] : memref<1x32x128xf32, #tpu.memory_space<vmem>>, vector<1x32x128xf32>
    %2 = vector.shape_cast %1 : vector<1x32x128xf32> to vector<32x128xf32>
    %3 = vector.shape_cast %0 : vector<1x128xf32> to vector<128xf32>
    %4 = vector.shape_cast %3 : vector<128xf32> to vector<1x128xf32>
    %5 = vector.broadcast %4 : vector<1x128xf32> to vector<32x128xf32>
    %6 = arith.mulf %2, %5 : vector<32x128xf32>
    %c0_4 = arith.constant 0 : index
    %c0_5 = arith.constant 0 : index
    %7 = vector.load %arg3[%c0_4, %c0_5] : memref<128x128xf32, #tpu.memory_space<vmem>>, vector<128x128xf32>
    %cst = arith.constant dense<0.000000e+00> : vector<32x128xf32>
    %8 = tpu.matmul %6, %7, %cst {dimension_numbers = #tpu.dot_dimension_numbers<[1], [0], [0], [1], [0, 0, 1, 1], [], []>} : vector<32x128xf32>, vector<128x128xf32>, vector<32x128xf32> -> vector<32x128xf32>
    %c0_6 = arith.constant 0 : index
    %c0_7 = arith.constant 0 : index
    %9 = vector.load %arg4[%c0_6, %c0_7] : memref<32x128xf32, #tpu.memory_space<vmem>>, vector<32x128xf32>
    tpu.vector_store %arg4[%c0_6, %c0_7], %8 {strides = array<i32>} : memref<32x128xf32, #tpu.memory_space<vmem>>, vector<32x128xf32>,
    return
  }
  func.func @transform_0(%arg0: i32) -> (i32, i32, i32) {
    %c0_i32 = arith.constant 0 : i32
    %c0_i32_0 = arith.constant 0 : i32
    %c0_i32_1 = arith.constant 0 : i32
    return %c0_i32, %arg0, %c0_i32_0 : i32, i32, i32
  }
  func.func @transform_1(%arg0: i32) -> (i32, i32) {
    %c0_i32 = arith.constant 0 : i32
    %c0_i32_0 = arith.constant 0 : i32
    %c0_i32_1 = arith.constant 0 : i32
    return %c0_i32, %c0_i32_0 : i32, i32
  }
  func.func @transform_2(%arg0: i32) -> (i32, i32) {
    %c0_i32 = arith.constant 0 : i32
    %c0_i32_0 = arith.constant 0 : i32
    %c0_i32_1 = arith.constant 0 : i32
    return %c0_i32, %c0_i32_0 : i32, i32
  }
  func.func @transform_3(%arg0: i32) -> (i32, i32) {
    %c0_i32 = arith.constant 0 : i32
    %c0_i32_0 = arith.constant 0 : i32
    return %arg0, %c0_i32 : i32, i32
  }
}

</mosaic_0001>

<bundles_post_ra>
// kernel: tpu_custom_call.1
= control target key start
LH: loop header
LB: loop body
LE: loop exit
PB: predicated region body
PF: predicated region fallthrough
CT: control target
= control target key end

     0   :  { %8 = vsyncpa [#allocation3], 0  ;;  %s438_s0 = inlined_call_operand.hbm [shape: f32[1,32,128], index: 0, kind: input, shape index: {}]   ;;  %s439_s1 = inlined_call_operand.vmem [shape: f32[1,128], index: 1, kind: input, shape index: {}]   ;;  %s440_s2 = inlined_call_operand.hbm [shape: f32[128,128], index: 2, kind: input, shape index: {}]   ;;  %s441_s3 = inlined_call_operand.hbm [shape: f32[32,128], index: 3, kind: output, shape index: {}]  }
   0x1   :  { %9 = vsyncpa [#allocation6], 0 }
   0x2   :  { %10 = vsyncpa [#allocation4], 0  ;;  %s365_s12 = smov [#allocation2]   ;;  %s293_s16 = scalar_lea.hbm %s438_s0, 512 }
   0x3   :  { %s16_s13 = sshll.u32 %s365_s12, 4  ;;  %p294_p0 = scmp.ne.s32.totalorder %s438_s0, %s293_s16  ;;  %s17_s13 = int_to_ptr.vmem [resolvable:$true] %s16_s13 }
   0x4   :  { %p297_p1 = scmp.lt.u32.totalorder %s293_s16, %s438_s0 }
   0x6   :  { %p299_p2 = pnand %p297_p1, %p294_p0 }
   0x8   :  { %302 = shalt.err (!%p299_p2)
}
   0x9   :  { %s303_s21 = scalar_lea.vmem %s17_s13, 512  ;;  %p308_p4 = scmp.lt.s32.totalorder %s17_s13, %s17_s13 }
   0xa   :  { %p304_p3 = scmp.ne.s32.totalorder %s17_s13, %s303_s21  ;;  %p309_p5 = scmp.lt.s32.totalorder %s303_s21, %s303_s21 }
   0xc   :  { %p310_p6 = por %p309_p5, %p308_p4 }
   0xe   :  { %p311_p7 = pnand %p310_p6, %p304_p3 }
  0x10   :  { %314 = shalt.err (!%p311_p7)
}
  0x11   :  { %s366_s22 = smov 128   ;;  %s367_s23 = smov 8  }
  0x12   :  { %22 = dma.hbm_to_vmem [thread:$0]  %s438_s0, 512, %s17_s13, [#allocation3], %s366_s22, %s366_s22, %s367_s23  }
  0x13   :  { %s368_s26 = smov [#allocation5]   ;;  %s315_s30 = scalar_lea.hbm %s440_s2, 2048 }
  0x14   :  { %s30_s27 = sshll.u32 %s368_s26, 4  ;;  %p316_p8 = scmp.ne.s32.totalorder %s440_s2, %s315_s30  ;;  %s31_s27 = int_to_ptr.vmem [resolvable:$true] %s30_s27 }
  0x15   :  { %p319_p9 = scmp.lt.u32.totalorder %s315_s30, %s440_s2 }
  0x17   :  { %p321_p10 = pnand %p319_p9, %p316_p8 }
  0x19   :  { %324 = shalt.err (!%p321_p10)
}
  0x1a   :  { %s325_s8 = scalar_lea.vmem %s31_s27, 2048  ;;  %p330_p12 = scmp.lt.s32.totalorder %s31_s27, %s31_s27 }
  0x1b   :  { %p326_p11 = scmp.ne.s32.totalorder %s31_s27, %s325_s8  ;;  %p331_p13 = scmp.lt.s32.totalorder %s325_s8, %s325_s8 }
  0x1d   :  { %p332_p0 = por %p331_p13, %p330_p12 }
  0x1f   :  { %p333_p1 = pnand %p332_p0, %p326_p11 }
  0x21   :  { %336 = shalt.err (!%p333_p1)
}
  0x22   :  { %36 = dma.hbm_to_vmem [thread:$0]  %s440_s2, 2048, %s31_s27, [#allocation6], %s366_s22, %s366_s22, %s367_s23  }
  0x23   :  { %359 = dma.done.wait [#allocation3], 512  }
  0x24   :  { %360 = vsyncadd [#allocation3], 4294966784 }
  0x25   :  { %361 = dma.done.wait [#allocation6], 2048  }
  0x26   :  { %362 = vsyncadd [#allocation6], 4294965248  ;;  %v58_v0 = vld [vmem:[#allocation5] sm:$0xff]  ;;  %v59_v1 = vld [vmem:[#allocation5 + $0x8] sm:$0xff] }
  0x27   :  { %v60_v2 = vld [vmem:[#allocation5 + $0x10] sm:$0xff]  ;;  %v240_v3 = vpack.c.bf16 %v59_v1, %v58_v0  ;;  %v61_v4 = vld [vmem:[#allocation5 + $0x18] sm:$0xff]  ;;  %v62_v6 = vld [vmem:[#allocation5 + $0x20] sm:$0xff] }
  0x28   :  { %v244_v5 = vpack.c.bf16 %v61_v4, %v60_v2  ;;  %v63_v7 = vld [vmem:[#allocation5 + $0x28] sm:$0xff]  ;;  %v181_v9 = vld [vmem:[%s439_s1] ss:$0 sm:$0xff]  ;;  %v64_v11 = vld [vmem:[#allocation5 + $0x30] sm:$0xff]  ;;  %s369_s1 = smov [#allocation7]  }
  0x29   :  { %241 = vmatprep.subr.bf16.mxu0 %v240_v3  ;;  %272 = vmatprep.subr.bf16.mxu1 %v240_v3  ;;  %v248_v8 = vpack.c.bf16 %v63_v7, %v62_v6  ;;  %v44_v10 = vld [vmem:[#allocation2] sm:$0xff]  ;;  %v65_v12 = vld [vmem:[#allocation5 + $0x38] sm:$0xff]  ;;  %v46_v14 = vld [vmem:[#allocation2 + $0x10] sm:$0xff]  ;;  %s168_s11 = sshll.u32 %s369_s1, 4  ;;  %s169_s11 = int_to_ptr.vmem [resolvable:$true] %s168_s11 }
  0x2a   :  { %243 = vmatpush3.bf16.msra.mxu0 %v240_v3  ;;  %280 = vmatpush3.bf16.msra.mxu1 %v240_v3  ;;  %v54_v13 = vmul.f32 %v181_v9, %v44_v10  ;;  %v56_v15 = vmul.f32 %v181_v9, %v46_v14  ;;  %v252_v16 = vpack.c.bf16 %v65_v12, %v64_v11  ;;  %v66_v17 = vld [vmem:[#allocation5 + $0x40] sm:$0xff]  ;;  %v67_v18 = vld [vmem:[#allocation5 + $0x48] sm:$0xff]  ;;  %v68_v20 = vld [vmem:[#allocation5 + $0x50] sm:$0xff]  ;;  %s337_s12 = scalar_lea.vmem %s169_s11, 512  ;;  %p342_p3 = scmp.lt.s32.totalorder %s169_s11, %s169_s11 }
  0x2b   :  { %245 = vmatprep.subr.bf16.mxu0 %v244_v5  ;;  %273 = vmatprep.subr.bf16.mxu1 %v244_v5  ;;  %v256_v19 = vpack.c.bf16 %v67_v18, %v66_v17  ;;  %v69_v21 = vld [vmem:[#allocation5 + $0x58] sm:$0xff]  ;;  %v70_v23 = vld [vmem:[#allocation5 + $0x60] sm:$0xff]  ;;  %v71_v24 = vld [vmem:[#allocation5 + $0x68] sm:$0xff]  ;;  %p338_p2 = scmp.ne.s32.totalorder %s169_s11, %s337_s12  ;;  %p343_p4 = scmp.lt.s32.totalorder %s337_s12, %s337_s12 }
  0x2c   :  { %234 = vmatprep.mubr.f32.mxu0 %v54_v13  ;;  %237 = vmatprep.mubr.f32.mxu1 %v56_v15  ;;  %v260_v22 = vpack.c.bf16 %v69_v21, %v68_v20  ;;  %v264_v25 = vpack.c.bf16 %v71_v24, %v70_v23  ;;  %v72_v26 = vld [vmem:[#allocation5 + $0x70] sm:$0xff]  ;;  %v73_v27 = vld [vmem:[#allocation5 + $0x78] sm:$0xff]  ;;  %v45_v29 = vld [vmem:[#allocation2 + $0x8] sm:$0xff] }
  0x2d   :  { %v268_v28 = vpack.c.bf16 %v73_v27, %v72_v26  ;;  %v47_v30 = vld [vmem:[#allocation2 + $0x18] sm:$0xff]  ;;  %v55_v31 = vmul.f32 %v181_v9, %v45_v29  ;;  %p344_p5 = por %p343_p4, %p342_p3 }
  0x2e   :  { %247 = vmatpush3.bf16.msra.mxu0 %v244_v5  ;;  %281 = vmatpush3.bf16.msra.mxu1 %v244_v5  ;;  %v57_v32 = vmul.f32 %v181_v9, %v47_v30 }
  0x2f   :  { %249 = vmatprep.subr.bf16.mxu0 %v248_v8  ;;  %274 = vmatprep.subr.bf16.mxu1 %v248_v8  ;;  %p345_p6 = pnand %p344_p5, %p338_p2 }
  0x32   :  { %251 = vmatpush3.bf16.msra.mxu0 %v248_v8  ;;  %282 = vmatpush3.bf16.msra.mxu1 %v248_v8 }
  0x33   :  { %253 = vmatprep.subr.bf16.mxu0 %v252_v16  ;;  %275 = vmatprep.subr.bf16.mxu1 %v252_v16 }
  0x36   :  { %255 = vmatpush3.bf16.msra.mxu0 %v252_v16  ;;  %283 = vmatpush3.bf16.msra.mxu1 %v252_v16 }
  0x37   :  { %257 = vmatprep.subr.bf16.mxu0 %v256_v19  ;;  %276 = vmatprep.subr.bf16.mxu1 %v256_v19 }
  0x3a   :  { %259 = vmatpush3.bf16.msra.mxu0 %v256_v19  ;;  %284 = vmatpush3.bf16.msra.mxu1 %v256_v19 }
  0x3b   :  { %261 = vmatprep.subr.bf16.mxu0 %v260_v22  ;;  %277 = vmatprep.subr.bf16.mxu1 %v260_v22 }
  0x3e   :  { %263 = vmatpush3.bf16.msra.mxu0 %v260_v22  ;;  %285 = vmatpush3.bf16.msra.mxu1 %v260_v22 }
  0x3f   :  { %265 = vmatprep.subr.bf16.mxu0 %v264_v25  ;;  %278 = vmatprep.subr.bf16.mxu1 %v264_v25 }
  0x42   :  { %267 = vmatpush3.bf16.msra.mxu0 %v264_v25  ;;  %286 = vmatpush3.bf16.msra.mxu1 %v264_v25 }
  0x43   :  { %269 = vmatprep.subr.bf16.mxu0 %v268_v28  ;;  %279 = vmatprep.subr.bf16.mxu1 %v268_v28 }
  0x46   :  { %271 = vmatpush3.bf16.msra.mxu0 %v268_v28  ;;  %287 = vmatpush3.bf16.msra.mxu1 %v268_v28 }
  0x49   :  { %235 = vmatmul.mubr.f32.vlgmr.msra.gmra.mrb[0].mxu0 %v55_v31  ;;  %238 = vmatmul.mubr.f32.vlgmr.msra.gmra.mrb[0].mxu1 %v57_v32 }
 0x11c   :  { %v236_v33 = vpop.f32.mrb[0].mxu0  ;;  %v239_v34 = vpop.f32.mrb[0].mxu1 }
 0x11d   :  { %160 = vst [vmem:[#allocation7 + $0x8] sm:$0xff] %v236_v33  ;;  %162 = vst [vmem:[#allocation7 + $0x18] sm:$0xff] %v239_v34  ;;  %v140_v35 = vpop.f32.mrb[1].mxu0  ;;  %v150_v36 = vpop.f32.mrb[1].mxu1 }
 0x11e   :  { %159 = vst [vmem:[#allocation7] sm:$0xff] %v140_v35  ;;  %161 = vst [vmem:[#allocation7 + $0x10] sm:$0xff] %v150_v36 }
 0x11f   :  { %348 = shalt.err (!%p345_p6)
}
 0x120   :  { %s349_s15 = scalar_lea.hbm %s441_s3, 512 }
 0x121   :  { %p350_p7 = scmp.ne.s32.totalorder %s441_s3, %s349_s15  ;;  %p353_p8 = scmp.lt.u32.totalorder %s349_s15, %s441_s3 }
 0x123   :  { %p355_p9 = pnand %p353_p8, %p350_p7 }
 0x125   :  { %358 = shalt.err (!%p355_p9)
}
 0x126   :  { %174 = dma.vmem_to_hbm [thread:$0]  %s169_s11, 512, %s441_s3, [#allocation4], %s366_s22, %s366_s22, %s367_s23  }
 0x127   :  { %363 = dma.done.wait [#allocation4], 512  }
 0x128   :  { %364 = vsyncadd [#allocation4], 4294966784 }
 0x129   :  { %178 = vsyncpa [#allocation3], 1 }
 0x12a   :  { %179 = vsyncpa [#allocation6], 1 }
 0x12b   :  { %180 = vsyncpa [#allocation4], 1 }

</bundles_post_ra>
